<compile_context>
chip_gen: v7x
topology: tpu7x:2x2x1
jax: 0.10.0
libtpu: 0.0.40
codegen_flags: <defaults>
</compile_context>

<pallas_src>
import functools

import jax
import jax.numpy as jnp
from jax.experimental import pallas as pl
from jax.experimental.pallas import tpu as pltpu

_LANE = 128


def _round_up(x, m):
    return (x + m - 1) // m * m


def _pick_batch_block(n):
    """Images per grid step; keep grid length >= 2 so v7x uses both TCs."""
    for b in (8, 4, 2):
        if n % b == 0 and n // b >= 2:
            return b
    return 1


def _three_conv_fused_kernel(x_ref, m_ref, w1_ref, b1_ref, w2_ref, b2_ref,
                             w3_ref, b3_ref, o_ref,
                             act1_ref, act2_ref, lhs1_ref, lhs2_ref,
                             *, Wp, Pp_pad, tap_base, pad_f):
    """B_blk images: 3 x (3x3 conv + bias + ReLU), channels-first flat layout.

    x_ref:    (B, Cin, act_len) bf16  flat padded inputs (interior @ lane pad_f)
    m_ref:    (1, Pp_pad)       f32   1.0 on real interior pixels, 0.0 on the
                                      zero ring and on the lane-pad columns
    wK_ref:   (Cout, 9*C)       bf16  weights, columns ordered (ky, kx, cin)
    bK_ref:   (Cout, 1)         f32
    o_ref:    (B, Cout, Pp_pad) f32   layer-3 output on the lane-padded grid
    actK_ref: (Cout, act_len)   bf16  inter-layer activations (VMEM, reused)
    lhsK_ref: (9*C, Pp_pad)     bf16  persistent im2col LHS scratch
    """
    B = x_ref.shape[0]
    Cin = x_ref.shape[1]
    Cout = o_ref.shape[1]

    # Hoisted once per grid step (shared across the B_blk images).
    keep = jnp.broadcast_to(m_ref[...] != 0.0, (Cout, Pp_pad))
    bias1 = jnp.broadcast_to(b1_ref[...], (Cout, Pp_pad))
    bias2 = jnp.broadcast_to(b2_ref[...], (Cout, Pp_pad))
    bias3 = jnp.broadcast_to(b3_ref[...], (Cout, Pp_pad))

    def conv_relu(src, C, lhs_ref, w_ref, bias):
        # src: (C, act_len) bf16 value (single load of the layer input).
        # Scatter the nine statically lane-shifted taps into the persistent
        # im2col scratch, then one (Cout, 9C) x (9C, Pp_pad) MXU matmul with
        # f32 accumulation.
        for ky in range(3):
            for kx in range(3):
                start = tap_base + ky * Wp + kx
                row = (3 * ky + kx) * C
                lhs_ref[row:row + C, :] = src[:, start:start + Pp_pad]
        y = jnp.dot(w_ref[...], lhs_ref[...],
                    preferred_element_type=jnp.float32)
        return jnp.maximum(y + bias, 0.0)          # (Cout, Pp_pad) f32

    def store_act(act_ref, y):
        # Single lane-aligned, unmasked store: interior starts at lane pad_f
        # (multiple of 128) and is Pp_pad (multiple of 128) wide.  The select
        # zeroes the border ring and the lane-pad columns (NaN-safe), which
        # is all the zeroing the next layer needs: interior output pixels
        # only ever read [pad_f, pad_f + Pp), which is fully rewritten here.
        act_ref[:, pad_f:pad_f + Pp_pad] = (
            jnp.where(keep, y, 0.0).astype(act_ref.dtype))

    for b in range(B):                              # B is a small static int
        y1 = conv_relu(x_ref[b], Cin, lhs1_ref, w1_ref, bias1)
        store_act(act1_ref, y1)
        y2 = conv_relu(act1_ref[...], Cout, lhs2_ref, w2_ref, bias2)
        store_act(act2_ref, y2)
        y3 = conv_relu(act2_ref[...], Cout, lhs2_ref, w3_ref, bias3)
        # Ring / lane-pad columns of y3 are cropped by the wrapper.
        o_ref[b] = y3.astype(o_ref.dtype)


@jax.jit
def three_conv_forward(x_nchw, params):
    """Forward of three_conv: 3 x (Conv2d 3x3 pad=1 + ReLU). NCHW in / out."""
    N, Cin, H, W = x_nchw.shape
    Cout = params[0][0].shape[0]
    Hp, Wp = H + 2, W + 2
    Pp = Hp * Wp
    Pp_pad = _round_up(Pp, _LANE)                  # lane-dense matmul N dim
    halo = Wp + 1                                  # flat halo for a 3x3 stencil
    pad_f = _round_up(halo, _LANE)                 # aligned interior start
    act_len = _round_up(pad_f + halo + Pp_pad, _LANE)
    tap_base = pad_f - halo                        # start of tap (ky=0,kx=0)

    B_blk = _pick_batch_block(N)
    num_blocks = N // B_blk

    # --- cheap layout glue (no im2col in HBM): pad by 1 pixel, flatten ---
    xp = jnp.pad(x_nchw, ((0, 0), (0, 0), (1, 1), (1, 1)))      # (N,Cin,Hp,Wp)
    xf = jnp.pad(xp.reshape(N, Cin, Pp),
                 ((0, 0), (0, 0), (pad_f, act_len - pad_f - Pp)))
    xf = xf.astype(jnp.bfloat16)                                # (N,Cin,act_len)

    # Interior mask over the lane-padded grid (ring and lane-pad cols = 0).
    hh = jnp.arange(Hp)[:, None]
    ww = jnp.arange(Wp)[None, :]
    interior = (hh >= 1) & (hh <= H) & (ww >= 1) & (ww <= W)
    mask = jnp.pad(interior.reshape(1, Pp),
                   ((0, 0), (0, Pp_pad - Pp))).astype(jnp.float32)

    # Weights as (Cout, 9*C) with columns ordered (ky, kx, cin) to match the
    # in-kernel tap rows; biases as (Cout, 1) f32.
    flat_w, flat_b = [], []
    for (w_oihw, b) in params:
        co, ci = w_oihw.shape[0], w_oihw.shape[1]
        w2d = jnp.transpose(w_oihw, (0, 2, 3, 1)).reshape(co, 9 * ci)
        flat_w.append(w2d.astype(jnp.bfloat16))
        flat_b.append(b.reshape(co, 1).astype(jnp.float32))

    kernel = functools.partial(_three_conv_fused_kernel, Wp=Wp, Pp_pad=Pp_pad,
                               tap_base=tap_base, pad_f=pad_f)

    def resident(shape):   # small operand kept resident in VMEM across the grid
        return pl.BlockSpec(shape, lambda n: tuple(0 for _ in shape))

    in_specs = [
        pl.BlockSpec((B_blk, Cin, act_len), lambda n: (n, 0, 0)),  # inputs
        resident((1, Pp_pad)),                                     # mask
        resident(flat_w[0].shape), resident(flat_b[0].shape),
        resident(flat_w[1].shape), resident(flat_b[1].shape),
        resident(flat_w[2].shape), resident(flat_b[2].shape),
    ]
    out_specs = pl.BlockSpec((B_blk, Cout, Pp_pad), lambda n: (n, 0, 0))
    scratch_shapes = [
        pltpu.VMEM((Cout, act_len), jnp.bfloat16),     # act1
        pltpu.VMEM((Cout, act_len), jnp.bfloat16),     # act2
        pltpu.VMEM((9 * Cin, Pp_pad), jnp.bfloat16),   # im2col LHS, layer 1
        pltpu.VMEM((9 * Cout, Pp_pad), jnp.bfloat16),  # im2col LHS, layers 2/3
    ]

    # VMEM budget: double-buffered in/out blocks + resident operands + scratch.
    per_step = (2 * B_blk * Cin * act_len * 2
                + 2 * B_blk * Cout * Pp_pad * 4
                + sum(w.size * 2 for w in flat_w)
                + sum(b.size * 4 for b in flat_b)
                + Pp_pad * 4
                + 2 * Cout * act_len * 2
                + 9 * (Cin + Cout) * Pp_pad * 2)
    vmem_limit = int(min(max(4 * per_step, 8 * 1024 * 1024), 32 * 1024 * 1024))

    out_flat = pl.pallas_call(
        kernel,
        out_shape=jax.ShapeDtypeStruct((N, Cout, Pp_pad), jnp.float32),
        grid=(num_blocks,),
        in_specs=in_specs,
        out_specs=out_specs,
        scratch_shapes=scratch_shapes,
        compiler_params=pltpu.CompilerParams(
            dimension_semantics=("parallel",),
            vmem_limit_bytes=vmem_limit),
    )(xf, mask, flat_w[0], flat_b[0], flat_w[1], flat_b[1],
      flat_w[2], flat_b[2])

    # Drop the lane padding and the zero ring: -> (N, Cout, H, W), NCHW.
    return out_flat[:, :, :Pp].reshape(N, Cout, Hp, Wp)[:, :, 1:H + 1, 1:W + 1]


def init_three_conv_params(key, in_ch, out_ch):
    """Deterministic params mimicking PyTorch Conv2d default init (OIHW)."""
    params = []
    ci = in_ch
    for _ in range(3):
        key, kw, kb = jax.random.split(key, 3)
        fan_in = ci * 3 * 3
        bound = 1.0 / float(fan_in) ** 0.5
        w = jax.random.uniform(kw, (out_ch, ci, 3, 3), jnp.float32,
                               minval=-bound, maxval=bound)
        b = jax.random.uniform(kb, (out_ch,), jnp.float32,
                               minval=-bound, maxval=bound)
        params.append((w, b))
        ci = out_ch
    return params


def _reference_forward(x_nchw, params):
    """Pure-JAX reference (lax conv), bf16-matched to the kernel's numerics."""
    x = x_nchw
    for (w, b) in params:
        y = jax.lax.conv_general_dilated(
            x.astype(jnp.bfloat16), w.astype(jnp.bfloat16),
            window_strides=(1, 1), padding="SAME",
            dimension_numbers=("NCHW", "OIHW", "NCHW"),
            preferred_element_type=jnp.float32)
        x = jnp.maximum(y + b[None, :, None, None], 0.0)
    return x


if __name__ == "__main__":
    key = jax.random.PRNGKey(0)
    k_x, k_p = jax.random.split(key)

    N, in_ch, out_ch, H, W = 2, 4, 8, 16, 16
    x = jax.random.normal(k_x, (N, in_ch, H, W), dtype=jnp.float32)
    params = init_three_conv_params(k_p, in_ch, out_ch)

    out = three_conv_forward(x, params)
    out = jax.block_until_ready(out)
    assert out.shape == (N, out_ch, H, W)

    ref = _reference_forward(x, params)
    max_err = float(jnp.max(jnp.abs(out - ref)))
    assert jnp.allclose(out, ref, atol=1e-2, rtol=1e-2), max_err

    print("KERNEL_OK")
</pallas_src>

<mosaic_0001>
module attributes {stable_mosaic.version = 11 : i64} {
  func.func @_three_conv_fused_kernel(%arg0: i32, %arg1: memref<1x4x640xbf16, #tpu.memory_space<vmem>>, %arg2: memref<1x384xf32, #tpu.memory_space<vmem>>, %arg3: memref<8x36xbf16, #tpu.memory_space<vmem>>, %arg4: memref<8x1xf32, #tpu.memory_space<vmem>>, %arg5: memref<8x72xbf16, #tpu.memory_space<vmem>>, %arg6: memref<8x1xf32, #tpu.memory_space<vmem>>, %arg7: memref<8x72xbf16, #tpu.memory_space<vmem>>, %arg8: memref<8x1xf32, #tpu.memory_space<vmem>>, %arg9: memref<1x8x384xf32, #tpu.memory_space<vmem>>, %arg10: memref<8x640xbf16, #tpu.memory_space<vmem>>, %arg11: memref<8x640xbf16, #tpu.memory_space<vmem>>, %arg12: memref<36x384xbf16, #tpu.memory_space<vmem>>, %arg13: memref<72x384xbf16, #tpu.memory_space<vmem>>) attributes {dimension_semantics = [#tpu.dimension_semantics<parallel>], iteration_bounds = array<i64: 2>, scalar_prefetch = 0 : i64, scratch_operands = 4 : i64, tpu.core_type = #tpu.core_type<tc>, window_params = [{transform_indices = @transform_0, window_bounds = array<i64: 1, 4, 640>}, {pipeline_mode = #tpu.pipeline_mode<synchronous>, transform_indices = @transform_1, window_bounds = array<i64: 1, 384>}, {pipeline_mode = #tpu.pipeline_mode<synchronous>, transform_indices = @transform_2, window_bounds = array<i64: 8, 36>}, {pipeline_mode = #tpu.pipeline_mode<synchronous>, transform_indices = @transform_3, window_bounds = array<i64: 8, 1>}, {pipeline_mode = #tpu.pipeline_mode<synchronous>, transform_indices = @transform_4, window_bounds = array<i64: 8, 72>}, {pipeline_mode = #tpu.pipeline_mode<synchronous>, transform_indices = @transform_5, window_bounds = array<i64: 8, 1>}, {pipeline_mode = #tpu.pipeline_mode<synchronous>, transform_indices = @transform_6, window_bounds = array<i64: 8, 72>}, {pipeline_mode = #tpu.pipeline_mode<synchronous>, transform_indices = @transform_7, window_bounds = array<i64: 8, 1>}, {transform_indices = @transform_8, window_bounds = array<i64: 1, 8, 384>}]} {
    %c0 = arith.constant 0 : index
    %c0_0 = arith.constant 0 : index
    %0 = vector.load %arg2[%c0, %c0_0] : memref<1x384xf32, #tpu.memory_space<vmem>>, vector<1x384xf32>
    %cst = arith.constant 0.000000e+00 : f32
    %1 = vector.broadcast %cst : f32 to vector<1x384xf32>
    %2 = arith.cmpf one, %0, %1 : vector<1x384xf32>
    %3 = vector.shape_cast %2 : vector<1x384xi1> to vector<1x384xi1>
    %4 = vector.broadcast %3 : vector<1x384xi1> to vector<8x384xi1>
    %c0_1 = arith.constant 0 : index
    %c0_2 = arith.constant 0 : index
    %5 = vector.load %arg4[%c0_1, %c0_2] : memref<8x1xf32, #tpu.memory_space<vmem>>, vector<8x1xf32>
    %6 = vector.shape_cast %5 : vector<8x1xf32> to vector<8x1xf32>
    %7 = vector.broadcast %6 : vector<8x1xf32> to vector<8x384xf32>
    %c0_3 = arith.constant 0 : index
    %c0_4 = arith.constant 0 : index
    %8 = vector.load %arg6[%c0_3, %c0_4] : memref<8x1xf32, #tpu.memory_space<vmem>>, vector<8x1xf32>
    %9 = vector.shape_cast %8 : vector<8x1xf32> to vector<8x1xf32>
    %10 = vector.broadcast %9 : vector<8x1xf32> to vector<8x384xf32>
    %c0_5 = arith.constant 0 : index
    %c0_6 = arith.constant 0 : index
    %11 = vector.load %arg8[%c0_5, %c0_6] : memref<8x1xf32, #tpu.memory_space<vmem>>, vector<8x1xf32>
    %12 = vector.shape_cast %11 : vector<8x1xf32> to vector<8x1xf32>
    %13 = vector.broadcast %12 : vector<8x1xf32> to vector<8x384xf32>
    %c0_7 = arith.constant 0 : index
    %c0_8 = arith.constant 0 : index
    %c0_9 = arith.constant 0 : index
    %14 = vector.load %arg1[%c0_7, %c0_8, %c0_9] : memref<1x4x640xbf16, #tpu.memory_space<vmem>>, vector<1x4x640xbf16>
    %15 = vector.shape_cast %14 : vector<1x4x640xbf16> to vector<4x640xbf16>
    %16 = vector.extract_strided_slice %15 {offsets = [0, 109], sizes = [4, 384], strides = [1, 1]} : vector<4x640xbf16> to vector<4x384xbf16>
    %c0_10 = arith.constant 0 : index
    %c0_11 = arith.constant 0 : index
    %17 = vector.load %arg12[%c0_10, %c0_11] : memref<36x384xbf16, #tpu.memory_space<vmem>>, vector<4x384xbf16>
    tpu.vector_store %arg12[%c0_10, %c0_11], %16 {strides = array<i32>} : memref<36x384xbf16, #tpu.memory_space<vmem>>, vector<4x384xbf16>,
    %18 = vector.extract_strided_slice %15 {offsets = [0, 110], sizes = [4, 384], strides = [1, 1]} : vector<4x640xbf16> to vector<4x384xbf16>
    %c4 = arith.constant 4 : index
    %c0_12 = arith.constant 0 : index
    %19 = vector.load %arg12[%c4, %c0_12] : memref<36x384xbf16, #tpu.memory_space<vmem>>, vector<4x384xbf16>
    tpu.vector_store %arg12[%c4, %c0_12], %18 {strides = array<i32>} : memref<36x384xbf16, #tpu.memory_space<vmem>>, vector<4x384xbf16>,
    %20 = vector.extract_strided_slice %15 {offsets = [0, 111], sizes = [4, 384], strides = [1, 1]} : vector<4x640xbf16> to vector<4x384xbf16>
    %c8 = arith.constant 8 : index
    %c0_13 = arith.constant 0 : index
    %21 = vector.load %arg12[%c8, %c0_13] : memref<36x384xbf16, #tpu.memory_space<vmem>>, vector<4x384xbf16>
    tpu.vector_store %arg12[%c8, %c0_13], %20 {strides = array<i32>} : memref<36x384xbf16, #tpu.memory_space<vmem>>, vector<4x384xbf16>,
    %22 = vector.extract_strided_slice %15 {offsets = [0, 127], sizes = [4, 384], strides = [1, 1]} : vector<4x640xbf16> to vector<4x384xbf16>
    %c12 = arith.constant 12 : index
    %c0_14 = arith.constant 0 : index
    %23 = vector.load %arg12[%c12, %c0_14] : memref<36x384xbf16, #tpu.memory_space<vmem>>, vector<4x384xbf16>
    tpu.vector_store %arg12[%c12, %c0_14], %22 {strides = array<i32>} : memref<36x384xbf16, #tpu.memory_space<vmem>>, vector<4x384xbf16>,
    %24 = vector.extract_strided_slice %15 {offsets = [0, 128], sizes = [4, 384], strides = [1, 1]} : vector<4x640xbf16> to vector<4x384xbf16>
    %c16 = arith.constant 16 : index
    %c0_15 = arith.constant 0 : index
    %25 = vector.load %arg12[%c16, %c0_15] : memref<36x384xbf16, #tpu.memory_space<vmem>>, vector<4x384xbf16>
    tpu.vector_store %arg12[%c16, %c0_15], %24 {strides = array<i32>} : memref<36x384xbf16, #tpu.memory_space<vmem>>, vector<4x384xbf16>,
    %26 = vector.extract_strided_slice %15 {offsets = [0, 129], sizes = [4, 384], strides = [1, 1]} : vector<4x640xbf16> to vector<4x384xbf16>
    %c20 = arith.constant 20 : index
    %c0_16 = arith.constant 0 : index
    %27 = vector.load %arg12[%c20, %c0_16] : memref<36x384xbf16, #tpu.memory_space<vmem>>, vector<4x384xbf16>
    tpu.vector_store %arg12[%c20, %c0_16], %26 {strides = array<i32>} : memref<36x384xbf16, #tpu.memory_space<vmem>>, vector<4x384xbf16>,
    %28 = vector.extract_strided_slice %15 {offsets = [0, 145], sizes = [4, 384], strides = [1, 1]} : vector<4x640xbf16> to vector<4x384xbf16>
    %c24 = arith.constant 24 : index
    %c0_17 = arith.constant 0 : index
    %29 = vector.load %arg12[%c24, %c0_17] : memref<36x384xbf16, #tpu.memory_space<vmem>>, vector<4x384xbf16>
    tpu.vector_store %arg12[%c24, %c0_17], %28 {strides = array<i32>} : memref<36x384xbf16, #tpu.memory_space<vmem>>, vector<4x384xbf16>,
    %30 = vector.extract_strided_slice %15 {offsets = [0, 146], sizes = [4, 384], strides = [1, 1]} : vector<4x640xbf16> to vector<4x384xbf16>
    %c28 = arith.constant 28 : index
    %c0_18 = arith.constant 0 : index
    %31 = vector.load %arg12[%c28, %c0_18] : memref<36x384xbf16, #tpu.memory_space<vmem>>, vector<4x384xbf16>
    tpu.vector_store %arg12[%c28, %c0_18], %30 {strides = array<i32>} : memref<36x384xbf16, #tpu.memory_space<vmem>>, vector<4x384xbf16>,
    %32 = vector.extract_strided_slice %15 {offsets = [0, 147], sizes = [4, 384], strides = [1, 1]} : vector<4x640xbf16> to vector<4x384xbf16>
    %c32 = arith.constant 32 : index
    %c0_19 = arith.constant 0 : index
    %33 = vector.load %arg12[%c32, %c0_19] : memref<36x384xbf16, #tpu.memory_space<vmem>>, vector<4x384xbf16>
    tpu.vector_store %arg12[%c32, %c0_19], %32 {strides = array<i32>} : memref<36x384xbf16, #tpu.memory_space<vmem>>, vector<4x384xbf16>,
    %c0_20 = arith.constant 0 : index
    %c0_21 = arith.constant 0 : index
    %34 = vector.load %arg3[%c0_20, %c0_21] : memref<8x36xbf16, #tpu.memory_space<vmem>>, vector<8x36xbf16>
    %c0_22 = arith.constant 0 : index
    %c0_23 = arith.constant 0 : index
    %35 = vector.load %arg12[%c0_22, %c0_23] : memref<36x384xbf16, #tpu.memory_space<vmem>>, vector<36x384xbf16>
    %cst_24 = arith.constant dense<0.000000e+00> : vector<8x384xf32>
    %36 = tpu.matmul %34, %35, %cst_24 {dimension_numbers = #tpu.dot_dimension_numbers<[1], [0], [0], [1], [0, 0, 1, 1], [], []>} : vector<8x36xbf16>, vector<36x384xbf16>, vector<8x384xf32> -> vector<8x384xf32>
    %37 = arith.addf %36, %7 : vector<8x384xf32>
    %cst_25 = arith.constant 0.000000e+00 : f32
    %38 = vector.broadcast %cst_25 : f32 to vector<8x384xf32>
    %39 = arith.maximumf %37, %38 : vector<8x384xf32>
    %cst_26 = arith.constant 0.000000e+00 : f32
    %40 = vector.broadcast %cst_26 : f32 to vector<8x384xf32>
    %41 = arith.select %4, %39, %40 : vector<8x384xi1>, vector<8x384xf32>
    %42 = arith.truncf %41 : vector<8x384xf32> to vector<8x384xbf16>
    %c0_27 = arith.constant 0 : index
    %c128 = arith.constant 128 : index
    %43 = vector.load %arg10[%c0_27, %c128] : memref<8x640xbf16, #tpu.memory_space<vmem>>, vector<8x384xbf16>
    tpu.vector_store %arg10[%c0_27, %c128], %42 {strides = array<i32>} : memref<8x640xbf16, #tpu.memory_space<vmem>>, vector<8x384xbf16>,
    %c0_28 = arith.constant 0 : index
    %c0_29 = arith.constant 0 : index
    %44 = vector.load %arg10[%c0_28, %c0_29] : memref<8x640xbf16, #tpu.memory_space<vmem>>, vector<8x640xbf16>
    %45 = vector.extract_strided_slice %44 {offsets = [0, 109], sizes = [8, 384], strides = [1, 1]} : vector<8x640xbf16> to vector<8x384xbf16>
    %c0_30 = arith.constant 0 : index
    %c0_31 = arith.constant 0 : index
    %46 = vector.load %arg13[%c0_30, %c0_31] : memref<72x384xbf16, #tpu.memory_space<vmem>>, vector<8x384xbf16>
    tpu.vector_store %arg13[%c0_30, %c0_31], %45 {strides = array<i32>} : memref<72x384xbf16, #tpu.memory_space<vmem>>, vector<8x384xbf16>,
    %47 = vector.extract_strided_slice %44 {offsets = [0, 110], sizes = [8, 384], strides = [1, 1]} : vector<8x640xbf16> to vector<8x384xbf16>
    %c8_32 = arith.constant 8 : index
    %c0_33 = arith.constant 0 : index
    %48 = vector.load %arg13[%c8_32, %c0_33] : memref<72x384xbf16, #tpu.memory_space<vmem>>, vector<8x384xbf16>
    tpu.vector_store %arg13[%c8_32, %c0_33], %47 {strides = array<i32>} : memref<72x384xbf16, #tpu.memory_space<vmem>>, vector<8x384xbf16>,
    %49 = vector.extract_strided_slice %44 {offsets = [0, 111], sizes = [8, 384], strides = [1, 1]} : vector<8x640xbf16> to vector<8x384xbf16>
    %c16_34 = arith.constant 16 : index
    %c0_35 = arith.constant 0 : index
    %50 = vector.load %arg13[%c16_34, %c0_35] : memref<72x384xbf16, #tpu.memory_space<vmem>>, vector<8x384xbf16>
    tpu.vector_store %arg13[%c16_34, %c0_35], %49 {strides = array<i32>} : memref<72x384xbf16, #tpu.memory_space<vmem>>, vector<8x384xbf16>,
    %51 = vector.extract_strided_slice %44 {offsets = [0, 127], sizes = [8, 384], strides = [1, 1]} : vector<8x640xbf16> to vector<8x384xbf16>
    %c24_36 = arith.constant 24 : index
    %c0_37 = arith.constant 0 : index
    %52 = vector.load %arg13[%c24_36, %c0_37] : memref<72x384xbf16, #tpu.memory_space<vmem>>, vector<8x384xbf16>
    tpu.vector_store %arg13[%c24_36, %c0_37], %51 {strides = array<i32>} : memref<72x384xbf16, #tpu.memory_space<vmem>>, vector<8x384xbf16>,
    %53 = vector.extract_strided_slice %44 {offsets = [0, 128], sizes = [8, 384], strides = [1, 1]} : vector<8x640xbf16> to vector<8x384xbf16>
    %c32_38 = arith.constant 32 : index
    %c0_39 = arith.constant 0 : index
    %54 = vector.load %arg13[%c32_38, %c0_39] : memref<72x384xbf16, #tpu.memory_space<vmem>>, vector<8x384xbf16>
    tpu.vector_store %arg13[%c32_38, %c0_39], %53 {strides = array<i32>} : memref<72x384xbf16, #tpu.memory_space<vmem>>, vector<8x384xbf16>,
    %55 = vector.extract_strided_slice %44 {offsets = [0, 129], sizes = [8, 384], strides = [1, 1]} : vector<8x640xbf16> to vector<8x384xbf16>
    %c40 = arith.constant 40 : index
    %c0_40 = arith.constant 0 : index
    %56 = vector.load %arg13[%c40, %c0_40] : memref<72x384xbf16, #tpu.memory_space<vmem>>, vector<8x384xbf16>
    tpu.vector_store %arg13[%c40, %c0_40], %55 {strides = array<i32>} : memref<72x384xbf16, #tpu.memory_space<vmem>>, vector<8x384xbf16>,
    %57 = vector.extract_strided_slice %44 {offsets = [0, 145], sizes = [8, 384], strides = [1, 1]} : vector<8x640xbf16> to vector<8x384xbf16>
    %c48 = arith.constant 48 : index
    %c0_41 = arith.constant 0 : index
    %58 = vector.load %arg13[%c48, %c0_41] : memref<72x384xbf16, #tpu.memory_space<vmem>>, vector<8x384xbf16>
    tpu.vector_store %arg13[%c48, %c0_41], %57 {strides = array<i32>} : memref<72x384xbf16, #tpu.memory_space<vmem>>, vector<8x384xbf16>,
    %59 = vector.extract_strided_slice %44 {offsets = [0, 146], sizes = [8, 384], strides = [1, 1]} : vector<8x640xbf16> to vector<8x384xbf16>
    %c56 = arith.constant 56 : index
    %c0_42 = arith.constant 0 : index
    %60 = vector.load %arg13[%c56, %c0_42] : memref<72x384xbf16, #tpu.memory_space<vmem>>, vector<8x384xbf16>
    tpu.vector_store %arg13[%c56, %c0_42], %59 {strides = array<i32>} : memref<72x384xbf16, #tpu.memory_space<vmem>>, vector<8x384xbf16>,
    %61 = vector.extract_strided_slice %44 {offsets = [0, 147], sizes = [8, 384], strides = [1, 1]} : vector<8x640xbf16> to vector<8x384xbf16>
    %c64 = arith.constant 64 : index
    %c0_43 = arith.constant 0 : index
    %62 = vector.load %arg13[%c64, %c0_43] : memref<72x384xbf16, #tpu.memory_space<vmem>>, vector<8x384xbf16>
    tpu.vector_store %arg13[%c64, %c0_43], %61 {strides = array<i32>} : memref<72x384xbf16, #tpu.memory_space<vmem>>, vector<8x384xbf16>,
    %c0_44 = arith.constant 0 : index
    %c0_45 = arith.constant 0 : index
    %63 = vector.load %arg5[%c0_44, %c0_45] : memref<8x72xbf16, #tpu.memory_space<vmem>>, vector<8x72xbf16>
    %c0_46 = arith.constant 0 : index
    %c0_47 = arith.constant 0 : index
    %64 = vector.load %arg13[%c0_46, %c0_47] : memref<72x384xbf16, #tpu.memory_space<vmem>>, vector<72x384xbf16>
    %cst_48 = arith.constant dense<0.000000e+00> : vector<8x384xf32>
    %65 = tpu.matmul %63, %64, %cst_48 {dimension_numbers = #tpu.dot_dimension_numbers<[1], [0], [0], [1], [0, 0, 1, 1], [], []>} : vector<8x72xbf16>, vector<72x384xbf16>, vector<8x384xf32> -> vector<8x384xf32>
    %66 = arith.addf %65, %10 : vector<8x384xf32>
    %cst_49 = arith.constant 0.000000e+00 : f32
    %67 = vector.broadcast %cst_49 : f32 to vector<8x384xf32>
    %68 = arith.maximumf %66, %67 : vector<8x384xf32>
    %cst_50 = arith.constant 0.000000e+00 : f32
    %69 = vector.broadcast %cst_50 : f32 to vector<8x384xf32>
    %70 = arith.select %4, %68, %69 : vector<8x384xi1>, vector<8x384xf32>
    %71 = arith.truncf %70 : vector<8x384xf32> to vector<8x384xbf16>
    %c0_51 = arith.constant 0 : index
    %c128_52 = arith.constant 128 : index
    %72 = vector.load %arg11[%c0_51, %c128_52] : memref<8x640xbf16, #tpu.memory_space<vmem>>, vector<8x384xbf16>
    tpu.vector_store %arg11[%c0_51, %c128_52], %71 {strides = array<i32>} : memref<8x640xbf16, #tpu.memory_space<vmem>>, vector<8x384xbf16>,
    %c0_53 = arith.constant 0 : index
    %c0_54 = arith.constant 0 : index
    %73 = vector.load %arg11[%c0_53, %c0_54] : memref<8x640xbf16, #tpu.memory_space<vmem>>, vector<8x640xbf16>
    %74 = vector.extract_strided_slice %73 {offsets = [0, 109], sizes = [8, 384], strides = [1, 1]} : vector<8x640xbf16> to vector<8x384xbf16>
    %c0_55 = arith.constant 0 : index
    %c0_56 = arith.constant 0 : index
    %75 = vector.load %arg13[%c0_55, %c0_56] : memref<72x384xbf16, #tpu.memory_space<vmem>>, vector<8x384xbf16>
    tpu.vector_store %arg13[%c0_55, %c0_56], %74 {strides = array<i32>} : memref<72x384xbf16, #tpu.memory_space<vmem>>, vector<8x384xbf16>,
    %76 = vector.extract_strided_slice %73 {offsets = [0, 110], sizes = [8, 384], strides = [1, 1]} : vector<8x640xbf16> to vector<8x384xbf16>
    %c8_57 = arith.constant 8 : index
    %c0_58 = arith.constant 0 : index
    %77 = vector.load %arg13[%c8_57, %c0_58] : memref<72x384xbf16, #tpu.memory_space<vmem>>, vector<8x384xbf16>
    tpu.vector_store %arg13[%c8_57, %c0_58], %76 {strides = array<i32>} : memref<72x384xbf16, #tpu.memory_space<vmem>>, vector<8x384xbf16>,
    %78 = vector.extract_strided_slice %73 {offsets = [0, 111], sizes = [8, 384], strides = [1, 1]} : vector<8x640xbf16> to vector<8x384xbf16>
    %c16_59 = arith.constant 16 : index
    %c0_60 = arith.constant 0 : index
    %79 = vector.load %arg13[%c16_59, %c0_60] : memref<72x384xbf16, #tpu.memory_space<vmem>>, vector<8x384xbf16>
    tpu.vector_store %arg13[%c16_59, %c0_60], %78 {strides = array<i32>} : memref<72x384xbf16, #tpu.memory_space<vmem>>, vector<8x384xbf16>,
    %80 = vector.extract_strided_slice %73 {offsets = [0, 127], sizes = [8, 384], strides = [1, 1]} : vector<8x640xbf16> to vector<8x384xbf16>
    %c24_61 = arith.constant 24 : index
    %c0_62 = arith.constant 0 : index
    %81 = vector.load %arg13[%c24_61, %c0_62] : memref<72x384xbf16, #tpu.memory_space<vmem>>, vector<8x384xbf16>
    tpu.vector_store %arg13[%c24_61, %c0_62], %80 {strides = array<i32>} : memref<72x384xbf16, #tpu.memory_space<vmem>>, vector<8x384xbf16>,
    %82 = vector.extract_strided_slice %73 {offsets = [0, 128], sizes = [8, 384], strides = [1, 1]} : vector<8x640xbf16> to vector<8x384xbf16>
    %c32_63 = arith.constant 32 : index
    %c0_64 = arith.constant 0 : index
    %83 = vector.load %arg13[%c32_63, %c0_64] : memref<72x384xbf16, #tpu.memory_space<vmem>>, vector<8x384xbf16>
    tpu.vector_store %arg13[%c32_63, %c0_64], %82 {strides = array<i32>} : memref<72x384xbf16, #tpu.memory_space<vmem>>, vector<8x384xbf16>,
    %84 = vector.extract_strided_slice %73 {offsets = [0, 129], sizes = [8, 384], strides = [1, 1]} : vector<8x640xbf16> to vector<8x384xbf16>
    %c40_65 = arith.constant 40 : index
    %c0_66 = arith.constant 0 : index
    %85 = vector.load %arg13[%c40_65, %c0_66] : memref<72x384xbf16, #tpu.memory_space<vmem>>, vector<8x384xbf16>
    tpu.vector_store %arg13[%c40_65, %c0_66], %84 {strides = array<i32>} : memref<72x384xbf16, #tpu.memory_space<vmem>>, vector<8x384xbf16>,
    %86 = vector.extract_strided_slice %73 {offsets = [0, 145], sizes = [8, 384], strides = [1, 1]} : vector<8x640xbf16> to vector<8x384xbf16>
    %c48_67 = arith.constant 48 : index
    %c0_68 = arith.constant 0 : index
    %87 = vector.load %arg13[%c48_67, %c0_68] : memref<72x384xbf16, #tpu.memory_space<vmem>>, vector<8x384xbf16>
    tpu.vector_store %arg13[%c48_67, %c0_68], %86 {strides = array<i32>} : memref<72x384xbf16, #tpu.memory_space<vmem>>, vector<8x384xbf16>,
    %88 = vector.extract_strided_slice %73 {offsets = [0, 146], sizes = [8, 384], strides = [1, 1]} : vector<8x640xbf16> to vector<8x384xbf16>
    %c56_69 = arith.constant 56 : index
    %c0_70 = arith.constant 0 : index
    %89 = vector.load %arg13[%c56_69, %c0_70] : memref<72x384xbf16, #tpu.memory_space<vmem>>, vector<8x384xbf16>
    tpu.vector_store %arg13[%c56_69, %c0_70], %88 {strides = array<i32>} : memref<72x384xbf16, #tpu.memory_space<vmem>>, vector<8x384xbf16>,
    %90 = vector.extract_strided_slice %73 {offsets = [0, 147], sizes = [8, 384], strides = [1, 1]} : vector<8x640xbf16> to vector<8x384xbf16>
    %c64_71 = arith.constant 64 : index
    %c0_72 = arith.constant 0 : index
    %91 = vector.load %arg13[%c64_71, %c0_72] : memref<72x384xbf16, #tpu.memory_space<vmem>>, vector<8x384xbf16>
    tpu.vector_store %arg13[%c64_71, %c0_72], %90 {strides = array<i32>} : memref<72x384xbf16, #tpu.memory_space<vmem>>, vector<8x384xbf16>,
    %c0_73 = arith.constant 0 : index
    %c0_74 = arith.constant 0 : index
    %92 = vector.load %arg7[%c0_73, %c0_74] : memref<8x72xbf16, #tpu.memory_space<vmem>>, vector<8x72xbf16>
    %c0_75 = arith.constant 0 : index
    %c0_76 = arith.constant 0 : index
    %93 = vector.load %arg13[%c0_75, %c0_76] : memref<72x384xbf16, #tpu.memory_space<vmem>>, vector<72x384xbf16>
    %cst_77 = arith.constant dense<0.000000e+00> : vector<8x384xf32>
    %94 = tpu.matmul %92, %93, %cst_77 {dimension_numbers = #tpu.dot_dimension_numbers<[1], [0], [0], [1], [0, 0, 1, 1], [], []>} : vector<8x72xbf16>, vector<72x384xbf16>, vector<8x384xf32> -> vector<8x384xf32>
    %95 = arith.addf %94, %13 : vector<8x384xf32>
    %cst_78 = arith.constant 0.000000e+00 : f32
    %96 = vector.broadcast %cst_78 : f32 to vector<8x384xf32>
    %97 = arith.maximumf %95, %96 : vector<8x384xf32>
    %c0_79 = arith.constant 0 : index
    %c0_80 = arith.constant 0 : index
    %c0_81 = arith.constant 0 : index
    %98 = vector.load %arg9[%c0_79, %c0_80, %c0_81] : memref<1x8x384xf32, #tpu.memory_space<vmem>>, vector<1x8x384xf32>
    %99 = vector.shape_cast %98 : vector<1x8x384xf32> to vector<8x384xf32>
    %100 = vector.shape_cast %97 : vector<8x384xf32> to vector<1x8x384xf32>
    tpu.vector_store %arg9[%c0_79, %c0_80, %c0_81], %100 {strides = array<i32>} : memref<1x8x384xf32, #tpu.memory_space<vmem>>, vector<1x8x384xf32>,
    return
  }
  func.func @transform_0(%arg0: i32) -> (i32, i32, i32) {
    %c0_i32 = arith.constant 0 : i32
    %c0_i32_0 = arith.constant 0 : i32
    %c0_i32_1 = arith.constant 0 : i32
    return %arg0, %c0_i32, %c0_i32_0 : i32, i32, i32
  }
  func.func @transform_1(%arg0: i32) -> (i32, i32) {
    %c0_i32 = arith.constant 0 : i32
    %c0_i32_0 = arith.constant 0 : i32
    %c0_i32_1 = arith.constant 0 : i32
    return %c0_i32, %c0_i32_0 : i32, i32
  }
  func.func @transform_2(%arg0: i32) -> (i32, i32) {
    %c0_i32 = arith.constant 0 : i32
    %c0_i32_0 = arith.constant 0 : i32
    %c0_i32_1 = arith.constant 0 : i32
    return %c0_i32, %c0_i32_0 : i32, i32
  }
  func.func @transform_3(%arg0: i32) -> (i32, i32) {
    %c0_i32 = arith.constant 0 : i32
    %c0_i32_0 = arith.constant 0 : i32
    %c0_i32_1 = arith.constant 0 : i32
    return %c0_i32, %c0_i32_0 : i32, i32
  }
  func.func @transform_4(%arg0: i32) -> (i32, i32) {
    %c0_i32 = arith.constant 0 : i32
    %c0_i32_0 = arith.constant 0 : i32
    %c0_i32_1 = arith.constant 0 : i32
    return %c0_i32, %c0_i32_0 : i32, i32
  }
  func.func @transform_5(%arg0: i32) -> (i32, i32) {
    %c0_i32 = arith.constant 0 : i32
    %c0_i32_0 = arith.constant 0 : i32
    %c0_i32_1 = arith.constant 0 : i32
    return %c0_i32, %c0_i32_0 : i32, i32
  }
  func.func @transform_6(%arg0: i32) -> (i32, i32) {
    %c0_i32 = arith.constant 0 : i32
    %c0_i32_0 = arith.constant 0 : i32
    %c0_i32_1 = arith.constant 0 : i32
    return %c0_i32, %c0_i32_0 : i32, i32
  }
  func.func @transform_7(%arg0: i32) -> (i32, i32) {
    %c0_i32 = arith.constant 0 : i32
    %c0_i32_0 = arith.constant 0 : i32
    %c0_i32_1 = arith.constant 0 : i32
    return %c0_i32, %c0_i32_0 : i32, i32
  }
  func.func @transform_8(%arg0: i32) -> (i32, i32, i32) {
    %c0_i32 = arith.constant 0 : i32
    %c0_i32_0 = arith.constant 0 : i32
    %c0_i32_1 = arith.constant 0 : i32
    return %arg0, %c0_i32, %c0_i32_0 : i32, i32, i32
  }
}

</mosaic_0001>

<bundles_post_ra>
// kernel: three_conv_forward.1
= control target key start
LH: loop header
LB: loop body
LE: loop exit
PB: predicated region body
PF: predicated region fallthrough
CT: control target
= control target key end

     0   :  { %s1614_s27 = smov 0   ;;  %s1865_s0 = inlined_call_operand.vmem [shape: bf16[2,4,640], index: 0, kind: input, shape index: {}]   ;;  %s1866_s1 = inlined_call_operand.vmem [shape: f32[1,384], index: 1, kind: input, shape index: {}]   ;;  %s1867_s2 = inlined_call_operand.vmem [shape: bf16[8,36], index: 2, kind: input, shape index: {}]   ;;  %s1868_s3 = inlined_call_operand.vmem [shape: f32[8,1], index: 3, kind: input, shape index: {}]   ;;  %s1869_s4 = inlined_call_operand.vmem [shape: bf16[8,72], index: 4, kind: input, shape index: {}]   ;;  %s1870_s5 = inlined_call_operand.vmem [shape: f32[8,1], index: 5, kind: input, shape index: {}]   ;;  %s1871_s6 = inlined_call_operand.vmem [shape: bf16[8,72], index: 6, kind: input, shape index: {}]   ;;  %s1872_s7 = inlined_call_operand.vmem [shape: f32[8,1], index: 7, kind: input, shape index: {}]   ;;  %s1873_s8 = inlined_call_operand.vmem [shape: f32[2,8,384], index: 8, kind: output, shape index: {}]  }
   0x1 LB: > { %s1382_s28 = sadd.s32 4294967295, %s1555_s27   ;;  %p1386_p0 = scmp.ge.s32.totalorder %s1555_s27, 1  ;;  %s1555_s27 = sphi %s1614_s27, %s18_s27  }
   0x2   : > { %p262_p1 = scmp.lt.s32.totalorder %s1555_s27, 3 }
   0x4   : > { %p263_p2 = pnand %p1386_p0, %p262_p1 }
   0x5   : > { %p296_p3 = scmp.lt.s32.totalorder (!%p263_p2), %s1382_s28, 1  ;;  %v310_v0 = vlaneseq (!%p263_p2)  ;;  %v1557_v1 = vmov (!%p263_p2), 1983009808   ;;  %s1558_s11 = smov (!%p263_p2), 18   ;;  %vm367_vm0 = vcmask (!%p263_p2), 1043456   ;;  %v1562_v15 = vmov (!%p263_p2), 0.0  }
   0x6   : > { %266 = sbr.rel (%p263_p2) target bundleno = 1178 (0x49a), region = 52  ;;  %v348_v2 = vunpack.c.l.s4 (!%p263_p2), %v1557_v1  ;;  %s1559_s12 = smov (!%p263_p2), 19   ;;  %1463 = vmatprep.subr.bf16.mxu1 (!%p263_p2), %v1562_v15  ;;  %v1567_v20 = vmov (!%p263_p2), 0   ;;  %vm1568_vm1 = vmmov (!%p263_p2), 0   ;;  %v325_v21 = vld [vmem:[%s1868_s3] sm:$0xff] (!%p263_p2)  ;;  %vm391_vm2 = vcmask (!%p263_p2), 146432  }
   0x7   : > { %v1624_v3 = vshrl.u32 (!%p263_p2), %v310_v0, 7  ;;  %s1560_s13 = smov (!%p263_p2), 1   ;;  %s1561_s14 = smov (!%p263_p2), 17   ;;  %610 = vmatprep.mubr.bf16.mxu0 (!%p263_p2), %v1567_v20  ;;  %1523 = vset.pattern.permute.xlu0 (!%p263_p2), %v1567_v20  ;;  %vm419_vm3 = vcmask (!%p263_p2), 7168   ;;  %vm369_vm4 = vcmask (!%p263_p2), 154624   ;;  %vm405_vm5 = vcmask (!%p263_p2), 138240  }
   0x8   : > { %v349_v4 = vunpack.c.0.s8 (!%p263_p2), %v348_v2  ;;  %s1563_s15 = smov (!%p263_p2), 127   ;;  %s1564_s16 = smov (!%p263_p2), 111   ;;  %1524 = vset.pattern.permute.xlu1 (!%p263_p2), %v1567_v20  ;;  %1469 = vmatprep.mubr.msk.bf16.mxu1 (!%p263_p2), %vm1568_vm1, %v1562_v15  ;;  %vm451_vm6 = vcmask (!%p263_p2), 1039360   ;;  %vm474_vm7 = vcmask (!%p263_p2), 908288   ;;  %vm490_vm8 = vcmask (!%p263_p2), 900096  }
   0x9   : > { %s1565_s17 = smov (!%p263_p2), 110   ;;  %s1566_s18 = smov (!%p263_p2), 109   ;;  %vm506_vm9 = vcmask (!%p263_p2), 891904   ;;  %vm568_vm10 = vcmask (!%p263_p2), 1041408   ;;  %vm564_vm11 = vcmask (!%p263_p2), 293888  }
   0xa   : > { %v352_v5 = vsub.s32 (!%p263_p2), %v349_v4, %v1624_v3 }
   0xd   : > { %s1875_s28 = smov (!%p296_p3, %s1382_s28), 1 }
   0xe   : > { %s1501_s29 = smul.u32 10, %s1875_s28 }
  0x10   : > { %s1631_s10 = scalar_lea.vmem %s1865_s0, %s1501_s29 }
  0x11   : > { %v343_v6 = vld [vmem:[%s1631_s10] sm:$0xff]  ;;  %v344_v16 = vld [vmem:[%s1631_s10 + $0x8] sm:$0x3] }
  0x12   : > { %v353_v7 = vrot.slane %v343_v6, %v352_v5  ;;  %v346_v8 = vcombine.high %v343_v6, %v343_v6  ;;  %v376_v9 = vcombine.low %v343_v6, %v343_v6  ;;  %v434_v17 = vcombine.low %v344_v16, %v344_v16 }
  0x13   : > { %v464_v18 = vrot.slane %v344_v16, %v352_v5 }
  0x14   : > { %386 = vrot.lane.b32.xlu1 %v353_v7, %s1558_s11  ;;  %361 = vrot.lane.b32.xlu0 %v353_v7, %s1559_s12  ;;  %v360_v10 = vrot.slane %v346_v8, %v352_v5  ;;  %v426_v11 = vrot.slane %v353_v7, 4  ;;  %v383_v13 = vrot.slane %v376_v9, %v352_v5  ;;  %v441_v19 = vrot.slane %v434_v17, %v352_v5 }
  0x16   : > { %v427_v12 = vrot.slane %v360_v10, 4 }
  0x18   : > { %414 = vrot.lane.b32.xlu1 %v353_v7, %s1560_s13  ;;  %398 = vrot.lane.b32.xlu0 %v353_v7, %s1561_s14  ;;  %v428_v14 = vsel %vm367_vm0, %v426_v11, %v427_v12  ;;  %432 = vst [vmem:[#allocation4 + $0x20] sm:$0x3] %v427_v12 }
  0x19   : > { %431 = vst [vmem:[#allocation4 + $0x18] sm:$0x33] %v428_v14 }
  0x1c   : > { %384 = vrot.lane.b32.xlu1 %v383_v13, %s1558_s11  ;;  %363 = vrot.lane.b32.xlu0 %v360_v10, %s1559_s12 }
  0x20   : > { %400 = vrot.lane.b32.xlu1 %v360_v10, %s1561_s14  ;;  %412 = vrot.lane.b32.xlu0 %v383_v13, %s1560_s13 }
  0x24   : > { %444 = vrot.lane.b32.xlu1 %v353_v7, %s1563_s15  ;;  %442 = vrot.lane.b32.xlu0 %v383_v13, %s1563_s15 }
  0x28   : > { %467 = vrot.lane.b32.xlu1 %v360_v10, %s1564_s16  ;;  %465 = vrot.lane.b32.xlu0 %v353_v7, %s1564_s16 }
  0x2c   : > { %483 = vrot.lane.b32.xlu1 %v353_v7, %s1565_s17  ;;  %481 = vrot.lane.b32.xlu0 %v383_v13, %s1565_s17 }
  0x30   : > { %499 = vrot.lane.b32.xlu1 %v360_v10, %s1566_s18  ;;  %497 = vrot.lane.b32.xlu0 %v353_v7, %s1566_s18 }
  0x34   : > { %469 = vrot.lane.b32.xlu1 %v464_v18, %s1564_s16  ;;  %446 = vrot.lane.b32.xlu0 %v441_v19, %s1563_s15 }
  0x38   : > { %501 = vrot.lane.b32.xlu1 %v464_v18, %s1566_s18  ;;  %485 = vrot.lane.b32.xlu0 %v441_v19, %s1565_s17 }
  0x3c   : > { %328 = vperm.xlu0 %1523, %v325_v21  }
  0x86   : > { %v387_v22 = vpop.permute.xlu1 %386  ;;  %v362_v23 = vpop.permute.xlu0 %361 }
  0x87   : > { %v389_v24 = vrot.slane %v387_v22, 4  ;;  %v365_v32 = vrot.slane %v362_v23, 4 }
  0x89   : > { %v393_v25 = vsel %vm391_vm2, %v387_v22, %v389_v24 }
  0x8a   : > { %397 = vst [vmem:[#allocation4 + $0x8] sm:$0xc] %v393_v25  ;;  %v415_v26 = vpop.permute.xlu1 %414  ;;  %v399_v27 = vpop.permute.xlu0 %398 }
  0x8b   : > { %v417_v28 = vrot.slane %v415_v26, 4  ;;  %v402_v42 = vrot.slane %v399_v27, 4 }
  0x8d   : > { %v421_v29 = vsel %vm419_vm3, %v415_v26, %v417_v28 }
  0x8e   : > { %425 = vst [vmem:[#allocation4 + $0x14] sm:$0xc] %v421_v29  ;;  %v385_v30 = vpop.permute.xlu1 %384  ;;  %v364_v31 = vpop.permute.xlu0 %363 }
  0x8f   : > { %v388_v33 = vrot.slane %v385_v30, 4  ;;  %v366_v34 = vrot.slane %v364_v31, 4 }
  0x91   : > { %v390_v35 = vsel %vm367_vm0, %v388_v33, %v389_v24  ;;  %v368_v36 = vsel %vm367_vm0, %v365_v32, %v366_v34  ;;  %v371_v37 = vsel %vm369_vm4, %v364_v31, %v366_v34  ;;  %v682_v34 = vld [vmem:[#allocation2 + $0x10] sm:$0xf] }
  0x92   : > { %v392_v38 = vsel %vm391_vm2, %v385_v30, %v390_v35  ;;  %v370_v39 = vsel %vm369_vm4, %v362_v23, %v368_v36  ;;  %375 = vst [vmem:[#allocation4 + $0x8] sm:$0x3] %v371_v37  ;;  %v401_v40 = vpop.permute.xlu1 %400  ;;  %v413_v41 = vpop.permute.xlu0 %412  ;;  %v513_v30 = vld [vmem:[%s1867_s2] sm:$0xf]  ;;  %749 = vrot.lane.b32.xlu0 %v682_v34, %s1563_s15  ;;  %764 = vrot.lane.b32.xlu1 %v682_v34, %s1564_s16  ;;  %v312_v36 = vsub.s32 0, %v1624_v3 }
  0x93   : > { %396 = vst [vmem:[#allocation4] sm:$0xcc] %v392_v38  ;;  %374 = vst [vmem:[#allocation4] sm:$0x33] %v370_v39  ;;  %v403_v43 = vrot.slane %v401_v40, 4  ;;  %v416_v44 = vrot.slane %v413_v41, 4 }
  0x94   : > { %v307_v35 = vld [vmem:[%s1866_s1] sm:$0x7]  ;;  %v316_v38 = vsub.s32 1, %v1624_v3 }
  0x95   : > { %v404_v45 = vsel %vm367_vm0, %v402_v42, %v403_v43  ;;  %v407_v46 = vsel %vm405_vm5, %v401_v40, %v403_v43  ;;  %v418_v47 = vsel %vm367_vm0, %v416_v44, %v417_v28  ;;  %vm308_vm12 = vcmp.ne.f32.partialorder %v307_v35, 0.0 }
  0x96   : > { %v406_v48 = vsel %vm405_vm5, %v399_v27, %v404_v45  ;;  %411 = vst [vmem:[#allocation4 + $0x14] sm:$0x3] %v407_v46  ;;  %v420_v49 = vsel %vm419_vm3, %v413_v41, %v418_v47  ;;  %v445_v50 = vpop.permute.xlu1 %444  ;;  %v443_v51 = vpop.permute.xlu0 %442  ;;  %v309_v37 = vsel %vm308_vm12, 1, %v1567_v20  ;;  %v320_v45 = vsub.s32 2, %v1624_v3 }
  0x97   : > { %410 = vst [vmem:[#allocation4 + $0xc] sm:$0x33] %v406_v48  ;;  %424 = vst [vmem:[#allocation4 + $0xc] sm:$0xcc] %v420_v49  ;;  %v449_v52 = vrot.slane %v445_v50, 4  ;;  %v448_v53 = vrot.slane %v443_v51, 4  ;;  %v1706_v40 = vrot.slane %v309_v37, %v312_v36  ;;  %v1708_v41 = vrot.slane %v309_v37, %v316_v38 }
  0x99   : > { %v450_v54 = vsel %vm367_vm0, %v448_v53, %v449_v52  ;;  %vm322_vm13 = vcmp.eq.s32.totalorder %v1706_v40, 1  ;;  %vm323_vm14 = vcmp.eq.s32.totalorder %v1708_v41, 1 }
  0x9a   : > { %v452_v55 = vsel %vm451_vm6, %v450_v54, %v445_v50  ;;  %v468_v56 = vpop.permute.xlu1 %467  ;;  %v466_v57 = vpop.permute.xlu0 %465 }
  0x9b   : > { %456 = vst [vmem:[#allocation4 + $0x18] sm:$0xcc] %v452_v55  ;;  %v472_v58 = vrot.slane %v468_v56, 4  ;;  %v471_v59 = vrot.slane %v466_v57, 4 }
  0x9d   : > { %v473_v60 = vsel %vm367_vm0, %v471_v59, %v472_v58  ;;  %v1528_v61 = vld [vmem:[#allocation4 + $0x8] ss:$12 sps:$4 sm:$0xff]  }
  0x9e   : > { %v475_v62 = vsel %vm474_vm7, %v473_v60, %v468_v56  ;;  %v484_v63 = vpop.permute.xlu1 %483  ;;  %v482_v0 = vpop.permute.xlu0 %481  ;;  %v1529_v1 = vld [vmem:[#allocation4 + $0x4] ss:$12 sps:$4 sm:$0xff]   ;;  %v1531_v2 = vld [vmem:[#allocation4] ss:$12 sps:$4 sm:$0xff]   ;;  %1464 = vmatpush3.bf16.msra.mxu1 %v1528_v61 }
  0x9f   : > { %479 = vst [vmem:[#allocation4 + $0x24] sm:$0x33] %v475_v62  ;;  %v488_v4 = vrot.slane %v484_v63, 4  ;;  %v487_v5 = vrot.slane %v482_v0, 4  ;;  %578 = vmatprep.subr.bf16.mxu0 %v1529_v1  ;;  %1465 = vmatprep.subr.bf16.mxu1 %v1562_v15 }
  0xa0   : > { %579 = vmatpush1.bf16.msra.mxu0 %v1531_v2 }
  0xa1   : > { %v489_v6 = vsel %vm367_vm0, %v487_v5, %v488_v4 }
  0xa2   : > { %v491_v7 = vsel %vm490_vm8, %v489_v6, %v484_v63  ;;  %v500_v8 = vpop.permute.xlu1 %499  ;;  %v498_v9 = vpop.permute.xlu0 %497 }
  0xa3   : > { %495 = vst [vmem:[#allocation4 + $0x24] sm:$0xcc] %v491_v7  ;;  %v504_v10 = vrot.slane %v500_v8, 4  ;;  %v503_v11 = vrot.slane %v498_v9, 4 }
  0xa5   : > { %v505_v12 = vsel %vm367_vm0, %v503_v11, %v504_v10 }
  0xa6   : > { %v507_v13 = vsel %vm506_vm9, %v505_v12, %v500_v8  ;;  %v470_v14 = vpop.permute.xlu1 %469  ;;  %v447_v16 = vpop.permute.xlu0 %446 }
  0xa7   : > { %511 = vst [vmem:[#allocation4 + $0x30] sm:$0x33] %v507_v13  ;;  %v476_v17 = vsel %vm474_vm7, %v472_v58, %v470_v14  ;;  %v453_v18 = vsel %vm451_vm6, %v449_v52, %v447_v16  ;;  %v1715_v52 = vrot.slane %v309_v37, %v320_v45 }
  0xa8   : > { %480 = vst [vmem:[#allocation4 + $0x2c] sm:$0x3] %v476_v17  ;;  %457 = vst [vmem:[#allocation4 + $0x20] sm:$0xc] %v453_v18 }
  0xa9   : > { %vm324_vm15 = vcmp.eq.s32.totalorder %v1715_v52, 1  ;;  %v337_v52 = vld [vmem:[%s1872_s7] sm:$0xff] }
  0xaa   : > { %v502_v19 = vpop.permute.xlu1 %501  ;;  %v486_v21 = vpop.permute.xlu0 %485  ;;  %v1532_v22 = vld [vmem:[#allocation4 + $0x1c] ss:$12 sps:$4 sm:$0xff]   ;;  %v1534_v23 = vld [vmem:[#allocation4 + $0x18] ss:$12 sps:$4 sm:$0xff]  }
  0xab   : > { %v508_v24 = vsel %vm506_vm9, %v504_v10, %v502_v19  ;;  %v492_v25 = vsel %vm490_vm8, %v488_v4, %v486_v21  ;;  %580 = vmatprep.subr.bf16.mxu0 %v1532_v22  ;;  %v331_v4 = vld [vmem:[%s1870_s5] sm:$0xff] }
  0xac   : > { %512 = vst [vmem:[#allocation4 + $0x38] sm:$0x3] %v508_v24  ;;  %496 = vst [vmem:[#allocation4 + $0x2c] sm:$0xc] %v492_v25  ;;  %581 = vmatpush1.bf16.msra.mxu0 %v1534_v23 }
  0xae   : > { %v522_v26 = vld [vmem:[#allocation4 + $0x30] sm:$0x33] }
  0xaf   : > { %v1396_v27 = vcombine.high %v522_v26, %v522_v26  ;;  %v1395_v28 = vcombine.low %v522_v26, %v522_v26 }
  0xb1   : > { %1398 = vmatprep.subr.msk.bf16.mxu0 %vm568_vm10, %v1396_v27  ;;  %v570_v29 = vsel %vm568_vm10, %v1395_v28, 0 }
  0xb2   : > { %583 = vmatpush1.bf16.msra.mxu0 %v570_v29 }
  0xb3   : > { %v1537_v31 = vld [vmem:[#allocation4 + $0x20] ss:$12 sps:$4 sm:$0xff]   ;;  %v1538_v32 = vld [vmem:[#allocation4 + $0x38] ss:$0 sps:$4 sm:$0x33]  }
  0xb4   : > { %1466 = vmatpush3.bf16.msra.mxu1 %v1537_v31  ;;  %v576_v33 = vsel %vm568_vm10, %v1538_v32, 0  ;;  %vm896_vm10 = vcmask 588800  }
  0xb5   : > { %1399 = vmatmul.mubr.msk.bf16.vlgmr.msra.gmra.mrb[0].mxu0 %vm564_vm11, %v513_v30  ;;  %1467 = vmatprep.subr.bf16.mxu1 %v1562_v15 }
  0xb6   : > { %942 = vmatprep.mubr.bf16.mxu0 %v1567_v20 }
  0xb8   : > { %1468 = vmatpush3.bf16.msra.mxu1 %v576_v33 }
  0xb9   : > { %1473 = vmatprep.subr.bf16.mxu1 %v1562_v15 }
  0xbb   : > { %1470 = vmatmul.mubr.msk.bf16.vlgmr.msra.gmra.mrb[0].mxu1 %vm564_vm11, %v513_v30  ;;  %v329_v39 = vpop.permute.xlu0 %328 }
  0xbc   : > { %1483 = vmatprep.mubr.msk.bf16.mxu1 %vm1568_vm1, %v1562_v15 }
 0x104   : > { %v750_v5 = vpop.permute.xlu0 %749  ;;  %v765_v6 = vpop.permute.xlu1 %764 }
 0x188   : > { %v612_v42 = vpop.f32.mrb[0].mxu0 }
 0x189   : > { %v613_v43 = vadd.f32 %v612_v42, %v329_v39  ;;  %v614_v44 = vpop.f32.mrb[1].mxu0 }
 0x18a   : > { %v615_v46 = vadd.f32 %v614_v44, %v329_v39  ;;  %v616_v47 = vpop.f32.mrb[2].mxu0 }
 0x18b   : > { %v659_v48 = vmax.f32 %v613_v43, 0.0  ;;  %v617_v49 = vpop.f32.mrb[3].mxu0 }
 0x18c   : > { %v660_v50 = vmax.f32 %v615_v46, 0.0 }
 0x18d   : > { %v662_v51 = vsel %vm322_vm13, %v659_v48, 0.0 }
 0x18e   : > { %v663_v53 = vsel %vm323_vm14, %v660_v50, 0.0  ;;  %v653_v55 = vpop.f32.mrb[0].mxu1 }
 0x18f   : > { %v1443_v54 = vpack.c.bf16 %v663_v53, %v662_v51  ;;  %v654_v3 = vadd.f32 %v653_v55, %v329_v39  ;;  %v1471_v56 = vpop.f32.mrb[1].mxu1 }
 0x190   : > { %v656_v57 = vpop.f32.mrb[2].mxu1 }
 0x191   : > { %678 = vst [vmem:[#allocation2 + $0x4] sm:$0xff] %v1443_v54  ;;  %v661_v58 = vmax.f32 %v654_v3, 0.0  ;;  %v1472_v59 = vpop.f32.mrb[3].mxu1 }
 0x193   : > { %v664_v60 = vsel %vm324_vm15, %v661_v58, 0.0 }
 0x194   : > { %v1444_v61 = vpack.c.bf16 %v664_v60, %v664_v60 }
 0x196   : > { %679 = vst [vmem:[#allocation2 + $0xc] sm:$0xf] %v1444_v61 }
 0x198   : > { %v680_v62 = vld [vmem:[#allocation2] sm:$0xff] }
 0x199   : > { %698 = vrot.lane.b32.xlu0 %v680_v62, %s1558_s11  ;;  %685 = vrot.lane.b32.xlu1 %v680_v62, %s1559_s12  ;;  %v737_v0 = vrot.slane %v680_v62, 4 }
 0x19d   : > { %711 = vrot.lane.b32.xlu0 %v680_v62, %s1561_s14  ;;  %v681_v63 = vld [vmem:[#allocation2 + $0x8] sm:$0xff] }
 0x19e   : > { %v738_v1 = vrot.slane %v681_v63, 4  ;;  %687 = vrot.lane.b32.xlu1 %v681_v63, %s1559_s12 }
 0x1a0   : > { %743 = vst [vmem:[#allocation5 + $0x38] sm:$0xf] %v738_v1  ;;  %v1728_v2 = vsel %vm367_vm0, %v737_v0, %v738_v1 }
 0x1a1   : > { %724 = vrot.lane.b32.xlu0 %v680_v62, %s1560_s13 }
 0x1a2   : > { %700 = vrot.lane.b32.xlu1 %v681_v63, %s1558_s11 }
 0x1a5   : > { %745 = vrot.lane.b32.xlu0 %v680_v62, %s1563_s15 }
 0x1a6   : > { %713 = vrot.lane.b32.xlu1 %v681_v63, %s1561_s14 }
 0x1a9   : > { %760 = vrot.lane.b32.xlu0 %v680_v62, %s1564_s16 }
 0x1aa   : > { %726 = vrot.lane.b32.xlu1 %v681_v63, %s1560_s13 }
 0x1ad   : > { %775 = vrot.lane.b32.xlu0 %v680_v62, %s1565_s17 }
 0x1ae   : > { %747 = vrot.lane.b32.xlu1 %v681_v63, %s1563_s15 }
 0x1b1   : > { %792 = vrot.lane.b32.xlu0 %v681_v63, %s1566_s18 }
 0x1b2   : > { %762 = vrot.lane.b32.xlu1 %v681_v63, %s1564_s16 }
 0x1b5   : > { %779 = vrot.lane.b32.xlu0 %v682_v34, %s1565_s17 }
 0x1b6   : > { %777 = vrot.lane.b32.xlu1 %v681_v63, %s1565_s17 }
 0x1b9   : > { %334 = vperm.xlu0 %1523, %v331_v4  }
 0x1ba   : > { %790 = vrot.lane.b32.xlu1 %v680_v62, %s1566_s18 }
 0x1be   : > { %794 = vrot.lane.b32.xlu1 %v682_v34, %s1566_s18 }
 0x20b   : > { %v699_v7 = vpop.permute.xlu0 %698  ;;  %v686_v8 = vpop.permute.xlu1 %685 }
 0x20c   : > { %v689_v13 = vrot.slane %v686_v8, 4  ;;  %v702_v17 = vrot.slane %v699_v7, 4 }
 0x20f   : > { %v712_v9 = vpop.permute.xlu0 %711 }
 0x210   : > { %v688_v10 = vpop.permute.xlu1 %687  ;;  %v715_v31 = vrot.slane %v712_v9, 4 }
 0x211   : > { %v690_v11 = vrot.slane %v688_v10, 4 }
 0x213   : > { %v725_v12 = vpop.permute.xlu0 %724  ;;  %v693_v14 = vsel %vm369_vm4, %v688_v10, %v690_v11  ;;  %v691_v18 = vsel %vm367_vm0, %v689_v13, %v690_v11 }
 0x214   : > { %697 = vst [vmem:[#allocation5 + $0x8] sm:$0xf] %v693_v14  ;;  %v701_v16 = vpop.permute.xlu1 %700  ;;  %v692_v24 = vsel %vm369_vm4, %v686_v8, %v691_v18  ;;  %v728_v34 = vrot.slane %v725_v12, 4 }
 0x215   : > { %v703_v19 = vrot.slane %v701_v16, 4 }
 0x217   : > { %v746_v21 = vpop.permute.xlu0 %745  ;;  %v704_v22 = vsel %vm367_vm0, %v702_v17, %v703_v19  ;;  %v706_v23 = vsel %vm391_vm2, %v701_v16, %v703_v19 }
 0x218   : > { %v705_v25 = vsel %vm391_vm2, %v699_v7, %v704_v22  ;;  %710 = vst [vmem:[#allocation5 + $0x14] sm:$0xf] %v706_v23  ;;  %v714_v26 = vpop.permute.xlu1 %713  ;;  %v751_v46 = vrot.slane %v746_v21, 4  ;;  %v805_v23 = vld [vmem:[%s1869_s4] sm:$0xf] }
 0x219   : > { %v716_v27 = vrot.slane %v714_v26, 4  ;;  %v1404_v28 = vcombine.high %v692_v24, %v705_v25  ;;  %v1403_v29 = vcombine.low %v692_v24, %v705_v25 }
 0x21b   : > { %v761_v30 = vpop.permute.xlu0 %760  ;;  %v719_v32 = vsel %vm405_vm5, %v714_v26, %v716_v27  ;;  %910 = vmatprep.subr.bf16.mxu0 %v1404_v28  ;;  %v717_v35 = vsel %vm367_vm0, %v715_v31, %v716_v27  ;;  %v1014_v26 = vld [vmem:[#allocation3 + $0x10] sm:$0xf] }
 0x21c   : > { %723 = vst [vmem:[#allocation5 + $0x20] sm:$0xf] %v719_v32  ;;  %v727_v33 = vpop.permute.xlu1 %726  ;;  %911 = vmatpush1.bf16.msra.mxu0 %v1403_v29  ;;  %v718_v43 = vsel %vm405_vm5, %v712_v9, %v717_v35  ;;  %v766_v58 = vrot.slane %v761_v30, 4  ;;  %1096 = vrot.lane.b32.xlu0 %v1014_v26, %s1564_s16 }
 0x21d   : > { %v729_v36 = vrot.slane %v727_v33, 4  ;;  %1081 = vrot.lane.b32.xlu1 %v1014_v26, %s1563_s15 }
 0x21f   : > { %v776_v37 = vpop.permute.xlu0 %775  ;;  %v730_v38 = vsel %vm367_vm0, %v728_v34, %v729_v36  ;;  %v732_v39 = vsel %vm419_vm3, %v727_v33, %v729_v36  ;;  %v1539_v42 = vld [vmem:[#allocation5 + $0x8] ss:$12 sps:$4 sm:$0xff]  }
 0x220   : > { %v731_v44 = vsel %vm419_vm3, %v725_v12, %v730_v38  ;;  %736 = vst [vmem:[#allocation5 + $0x2c] sm:$0xf] %v732_v39  ;;  %v748_v45 = vpop.permute.xlu1 %747  ;;  %1474 = vmatpush3.bf16.msra.mxu1 %v1539_v42  ;;  %v781_v63 = vrot.slane %v776_v37, 4 }
 0x221   : > { %v752_v47 = vrot.slane %v748_v45, 4  ;;  %v1407_v48 = vcombine.high %v718_v43, %v731_v44  ;;  %v1406_v49 = vcombine.low %v718_v43, %v731_v44  ;;  %1475 = vmatprep.subr.bf16.mxu1 %v1562_v15 }
 0x223   : > { %v753_v50 = vsel %vm367_vm0, %v751_v46, %v752_v47  ;;  %v755_v51 = vsel %vm451_vm6, %v752_v47, %v750_v5  ;;  %912 = vmatprep.subr.bf16.mxu0 %v1407_v48  ;;  %v793_v54 = vpop.permute.xlu0 %792 }
 0x224   : > { %v754_v53 = vsel %vm451_vm6, %v753_v50, %v748_v45  ;;  %759 = vst [vmem:[#allocation5 + $0x44] sm:$0xf] %v755_v51  ;;  %v763_v55 = vpop.permute.xlu1 %762  ;;  %913 = vmatpush1.bf16.msra.mxu0 %v1406_v49  ;;  %v797_v9 = vrot.slane %v793_v54, 4 }
 0x225   : > { %v767_v3 = vrot.slane %v763_v55, 4  ;;  %v1410_v56 = vcombine.high %v1728_v2, %v754_v53  ;;  %v1409_v57 = vcombine.low %v1728_v2, %v754_v53 }
 0x227   : > { %v770_v59 = vsel %vm474_vm7, %v767_v3, %v765_v6  ;;  %v1540_v60 = vld [vmem:[#allocation5 + $0x20] ss:$12 sps:$4 sm:$0xff]   ;;  %914 = vmatprep.subr.bf16.mxu0 %v1410_v56  ;;  %v780_v62 = vpop.permute.xlu0 %779  ;;  %v768_v0 = vsel %vm367_vm0, %v766_v58, %v767_v3 }
 0x228   : > { %774 = vst [vmem:[#allocation5 + $0x50] sm:$0xf] %v770_v59  ;;  %v778_v61 = vpop.permute.xlu1 %777  ;;  %915 = vmatpush1.bf16.msra.mxu0 %v1409_v57  ;;  %1476 = vmatpush3.bf16.msra.mxu1 %v1540_v60  ;;  %v769_v6 = vsel %vm474_vm7, %v768_v0, %v763_v55 }
 0x229   : > { %v782_v1 = vrot.slane %v778_v61, 4  ;;  %1477 = vmatprep.subr.bf16.mxu1 %v1562_v15 }
 0x22b   : > { %v783_v4 = vsel %vm367_vm0, %v781_v63, %v782_v1  ;;  %v785_v2 = vsel %vm490_vm8, %v782_v1, %v780_v62  ;;  %v1541_v5 = vld [vmem:[#allocation5 + $0x38] ss:$12 sps:$4 sm:$0xff]  }
 0x22c   : > { %v784_v7 = vsel %vm490_vm8, %v783_v4, %v778_v61  ;;  %789 = vst [vmem:[#allocation5 + $0x5c] sm:$0xf] %v785_v2  ;;  %v791_v8 = vpop.permute.xlu1 %790  ;;  %1478 = vmatpush3.bf16.msra.mxu1 %v1541_v5 }
 0x22d   : > { %v796_v10 = vrot.slane %v791_v8, 4  ;;  %v1413_v11 = vcombine.high %v769_v6, %v784_v7  ;;  %v1412_v12 = vcombine.low %v769_v6, %v784_v7  ;;  %1479 = vmatprep.subr.bf16.mxu1 %v1562_v15 }
 0x22f   : > { %v798_v13 = vsel %vm367_vm0, %v796_v10, %v797_v9  ;;  %916 = vmatprep.subr.bf16.mxu0 %v1413_v11 }
 0x230   : > { %v799_v14 = vsel %vm506_vm9, %v798_v13, %v793_v54  ;;  %v795_v16 = vpop.permute.xlu1 %794  ;;  %917 = vmatpush1.bf16.msra.mxu0 %v1412_v12 }
 0x231   : > { %v800_v17 = vsel %vm506_vm9, %v797_v9, %v795_v16  ;;  %v1416_v18 = vcombine.high %v799_v14, %v799_v14  ;;  %v1415_v19 = vcombine.low %v799_v14, %v799_v14 }
 0x232   : > { %804 = vst [vmem:[#allocation5 + $0x68] sm:$0xf] %v800_v17 }
 0x233   : > { %v1542_v21 = vld [vmem:[#allocation5 + $0x50] ss:$12 sps:$4 sm:$0xff]   ;;  %1418 = vmatprep.subr.msk.bf16.mxu0 %vm367_vm0, %v1416_v18  ;;  %v902_v22 = vsel %vm367_vm0, %v1415_v19, 0 }
 0x234   : > { %919 = vmatpush1.bf16.msra.mxu0 %v902_v22  ;;  %1480 = vmatpush3.bf16.msra.mxu1 %v1542_v21 }
 0x235   : > { %1481 = vmatprep.subr.bf16.mxu1 %v1562_v15 }
 0x237   : > { %1419 = vmatmul.mubr.msk.bf16.vlgmr.msra.gmra.mrb[4].mxu0 %vm896_vm10, %v805_v23 }
 0x238   : > { %1272 = vmatprep.mubr.bf16.mxu0 %v1567_v20  ;;  %v335_v27 = vpop.permute.xlu0 %334 }
 0x239   : > { %v1543_v24 = vld [vmem:[#allocation5 + $0x68] ss:$0 sps:$4 sm:$0xff]  }
 0x23a   : > { %v908_v25 = vsel %vm367_vm0, %v1543_v24, 0 }
 0x23b   : > { %1482 = vmatpush3.bf16.msra.mxu1 %v908_v25 }
 0x23c   : > { %1487 = vmatprep.subr.bf16.mxu1 %v1562_v15 }
 0x23e   : > { %1484 = vmatmul.mubr.msk.bf16.vlgmr.msra.gmra.mrb[4].mxu1 %vm896_vm10, %v805_v23 }
 0x23f   : > { %1497 = vmatprep.mubr.msk.bf16.mxu1 %vm1568_vm1, %v1562_v15 }
 0x28e   : > { %v1097_v54 = vpop.permute.xlu0 %1096 }
 0x28f   : > { %v1082_v51 = vpop.permute.xlu1 %1081 }
 0x30a   : > { %v944_v28 = vpop.f32.mrb[4].mxu0 }
 0x30b   : > { %v945_v29 = vadd.f32 %v944_v28, %v335_v27  ;;  %v946_v20 = vpop.f32.mrb[5].mxu0 }
 0x30c   : > { %v947_v30 = vadd.f32 %v946_v20, %v335_v27  ;;  %v948_v31 = vpop.f32.mrb[6].mxu0 }
 0x30d   : > { %v991_v32 = vmax.f32 %v945_v29, 0.0  ;;  %v949_v33 = vpop.f32.mrb[7].mxu0 }
 0x30e   : > { %v992_v34 = vmax.f32 %v947_v30, 0.0 }
 0x30f   : > { %v994_v35 = vsel %vm322_vm13, %v991_v32, 0.0 }
 0x310   : > { %v995_v36 = vsel %vm323_vm14, %v992_v34, 0.0 }
 0x311   : > { %v1445_v37 = vpack.c.bf16 %v995_v36, %v994_v35  ;;  %v985_v38 = vpop.f32.mrb[4].mxu1 }
 0x312   : > { %v986_v39 = vadd.f32 %v985_v38, %v335_v27  ;;  %v1485_v42 = vpop.f32.mrb[5].mxu1 }
 0x313   : > { %1010 = vst [vmem:[#allocation3 + $0x4] sm:$0xff] %v1445_v37  ;;  %v988_v43 = vpop.f32.mrb[6].mxu1 }
 0x314   : > { %v993_v44 = vmax.f32 %v986_v39, 0.0  ;;  %v1486_v45 = vpop.f32.mrb[7].mxu1 }
 0x316   : > { %v996_v46 = vsel %vm324_vm15, %v993_v44, 0.0 }
 0x317   : > { %v1446_v47 = vpack.c.bf16 %v996_v46, %v996_v46 }
 0x319   : > { %1011 = vst [vmem:[#allocation3 + $0xc] sm:$0xf] %v1446_v47 }
 0x31a   : > { %v1012_v48 = vld [vmem:[#allocation3] sm:$0xff] }
 0x31b   : > { %1017 = vrot.lane.b32.xlu1 %v1012_v48, %s1559_s12  ;;  %v1069_v49 = vrot.slane %v1012_v48, 4 }
 0x31f   : > { %1030 = vrot.lane.b32.xlu1 %v1012_v48, %s1558_s11 }
 0x320   : > { %v1013_v40 = vld [vmem:[#allocation3 + $0x8] sm:$0xff] }
 0x321   : > { %1019 = vrot.lane.b32.xlu0 %v1013_v40, %s1559_s12  ;;  %v1070_v41 = vrot.slane %v1013_v40, 4 }
 0x323   : > { %1043 = vrot.lane.b32.xlu1 %v1012_v48, %s1561_s14  ;;  %1075 = vst [vmem:[#allocation5 + $0x38] sm:$0xf] %v1070_v41  ;;  %v1801_v50 = vsel %vm367_vm0, %v1069_v49, %v1070_v41 }
 0x325   : > { %1032 = vrot.lane.b32.xlu0 %v1013_v40, %s1558_s11 }
 0x327   : > { %1056 = vrot.lane.b32.xlu1 %v1012_v48, %s1560_s13 }
 0x329   : > { %1045 = vrot.lane.b32.xlu0 %v1013_v40, %s1561_s14 }
 0x32b   : > { %1077 = vrot.lane.b32.xlu1 %v1012_v48, %s1563_s15 }
 0x32d   : > { %1058 = vrot.lane.b32.xlu0 %v1013_v40, %s1560_s13  ;;  %s1502_s13 = smul.u32 24, %s1875_s28 }
 0x32f   : > { %1092 = vrot.lane.b32.xlu1 %v1012_v48, %s1564_s16 }
 0x331   : > { %1079 = vrot.lane.b32.xlu0 %v1013_v40, %s1563_s15 }
 0x333   : > { %1107 = vrot.lane.b32.xlu1 %v1012_v48, %s1565_s17 }
 0x335   : > { %1094 = vrot.lane.b32.xlu0 %v1013_v40, %s1564_s16  ;;  %s305_s16 = scalar_lea.vmem %s1873_s8, %s1502_s13 }
 0x337   : > { %1124 = vrot.lane.b32.xlu1 %v1013_v40, %s1566_s18 }
 0x339   : > { %1109 = vrot.lane.b32.xlu0 %v1013_v40, %s1565_s17 }
 0x33b   : > { %1111 = vrot.lane.b32.xlu1 %v1014_v26, %s1565_s17 }
 0x33d   : > { %1122 = vrot.lane.b32.xlu0 %v1012_v48, %s1566_s18 }
 0x33f   : > { %340 = vperm.xlu1 %1524, %v337_v52  }
 0x341   : > { %1126 = vrot.lane.b32.xlu0 %v1014_v26, %s1566_s18 }
 0x38d   : > { %v1018_v53 = vpop.permute.xlu1 %1017 }
 0x38e   : > { %v1021_v57 = vrot.slane %v1018_v53, 4 }
 0x391   : > { %v1031_v55 = vpop.permute.xlu1 %1030 }
 0x392   : > { %v1034_v0 = vrot.slane %v1031_v55, 4 }
 0x393   : > { %v1020_v3 = vpop.permute.xlu0 %1019 }
 0x394   : > { %v1022_v56 = vrot.slane %v1020_v3, 4 }
 0x395   : > { %v1044_v58 = vpop.permute.xlu1 %1043 }
 0x396   : > { %v1025_v59 = vsel %vm369_vm4, %v1020_v3, %v1022_v56  ;;  %v1023_v60 = vsel %vm367_vm0, %v1021_v57, %v1022_v56  ;;  %v1047_v8 = vrot.slane %v1044_v58, 4 }
 0x397   : > { %1029 = vst [vmem:[#allocation5 + $0x8] sm:$0xf] %v1025_v59  ;;  %v1024_v61 = vsel %vm369_vm4, %v1018_v53, %v1023_v60  ;;  %v1033_v62 = vpop.permute.xlu0 %1032 }
 0x398   : > { %v1035_v63 = vrot.slane %v1033_v62, 4 }
 0x399   : > { %v1057_v1 = vpop.permute.xlu1 %1056 }
 0x39a   : > { %v1038_v4 = vsel %vm391_vm2, %v1033_v62, %v1035_v63  ;;  %v1036_v2 = vsel %vm367_vm0, %v1034_v0, %v1035_v63  ;;  %v1060_v18 = vrot.slane %v1057_v1, 4  ;;  %v1137_v63 = vld [vmem:[%s1871_s6] sm:$0xf] }
 0x39b   : > { %1042 = vst [vmem:[#allocation5 + $0x14] sm:$0xf] %v1038_v4  ;;  %v1037_v5 = vsel %vm391_vm2, %v1031_v55, %v1036_v2  ;;  %v1046_v6 = vpop.permute.xlu0 %1045 }
 0x39c   : > { %v1048_v7 = vrot.slane %v1046_v6, 4  ;;  %v1423_v10 = vcombine.low %v1024_v61, %v1037_v5  ;;  %v1424_v11 = vcombine.high %v1024_v61, %v1037_v5 }
 0x39d   : > { %v1078_v9 = vpop.permute.xlu1 %1077 }
 0x39e   : > { %v1051_v12 = vsel %vm405_vm5, %v1046_v6, %v1048_v7  ;;  %v1049_v13 = vsel %vm367_vm0, %v1047_v8, %v1048_v7  ;;  %1240 = vmatprep.subr.bf16.mxu0 %v1424_v11  ;;  %v1083_v27 = vrot.slane %v1078_v9, 4 }
 0x39f   : > { %1055 = vst [vmem:[#allocation5 + $0x20] sm:$0xf] %v1051_v12  ;;  %v1050_v14 = vsel %vm405_vm5, %v1044_v58, %v1049_v13  ;;  %v1059_v16 = vpop.permute.xlu0 %1058  ;;  %1241 = vmatpush1.bf16.msra.mxu0 %v1423_v10 }
 0x3a0   : > { %v1061_v17 = vrot.slane %v1059_v16, 4 }
 0x3a1   : > { %v1093_v19 = vpop.permute.xlu1 %1092 }
 0x3a2   : > { %v1064_v21 = vsel %vm419_vm3, %v1059_v16, %v1061_v17  ;;  %v1062_v22 = vsel %vm367_vm0, %v1060_v18, %v1061_v17  ;;  %v1544_v23 = vld [vmem:[#allocation5 + $0x8] ss:$12 sps:$4 sm:$0xff]   ;;  %v1098_v35 = vrot.slane %v1093_v19, 4 }
 0x3a3   : > { %1068 = vst [vmem:[#allocation5 + $0x2c] sm:$0xf] %v1064_v21  ;;  %v1063_v24 = vsel %vm419_vm3, %v1057_v1, %v1062_v22  ;;  %v1080_v25 = vpop.permute.xlu0 %1079  ;;  %1488 = vmatpush3.bf16.msra.mxu1 %v1544_v23 }
 0x3a4   : > { %v1084_v26 = vrot.slane %v1080_v25, 4  ;;  %v1426_v29 = vcombine.low %v1050_v14, %v1063_v24  ;;  %v1427_v20 = vcombine.high %v1050_v14, %v1063_v24  ;;  %1489 = vmatprep.subr.bf16.mxu1 %v1562_v15 }
 0x3a5   : > { %v1108_v28 = vpop.permute.xlu1 %1107 }
 0x3a6   : > { %v1087_v30 = vsel %vm451_vm6, %v1084_v26, %v1082_v51  ;;  %v1085_v31 = vsel %vm367_vm0, %v1083_v27, %v1084_v26  ;;  %1242 = vmatprep.subr.bf16.mxu0 %v1427_v20  ;;  %v1113_v47 = vrot.slane %v1108_v28, 4 }
 0x3a7   : > { %1091 = vst [vmem:[#allocation5 + $0x44] sm:$0xf] %v1087_v30  ;;  %v1086_v32 = vsel %vm451_vm6, %v1085_v31, %v1080_v25  ;;  %v1095_v33 = vpop.permute.xlu0 %1094  ;;  %1243 = vmatpush1.bf16.msra.mxu0 %v1426_v29 }
 0x3a8   : > { %v1099_v34 = vrot.slane %v1095_v33, 4  ;;  %v1429_v37 = vcombine.low %v1801_v50, %v1086_v32  ;;  %v1430_v38 = vcombine.high %v1801_v50, %v1086_v32 }
 0x3a9   : > { %v1125_v36 = vpop.permute.xlu1 %1124 }
 0x3aa   : > { %v1102_v39 = vsel %vm474_vm7, %v1099_v34, %v1097_v54  ;;  %v1100_v42 = vsel %vm367_vm0, %v1098_v35, %v1099_v34  ;;  %v1545_v43 = vld [vmem:[#allocation5 + $0x20] ss:$12 sps:$4 sm:$0xff]   ;;  %1244 = vmatprep.subr.bf16.mxu0 %v1430_v38  ;;  %v1129_v53 = vrot.slane %v1125_v36, 4 }
 0x3ab   : > { %1106 = vst [vmem:[#allocation5 + $0x50] sm:$0xf] %v1102_v39  ;;  %v1101_v44 = vsel %vm474_vm7, %v1100_v42, %v1095_v33  ;;  %v1110_v45 = vpop.permute.xlu0 %1109  ;;  %1245 = vmatpush1.bf16.msra.mxu0 %v1429_v37  ;;  %1490 = vmatpush3.bf16.msra.mxu1 %v1545_v43 }
 0x3ac   : > { %v1114_v46 = vrot.slane %v1110_v45, 4  ;;  %1491 = vmatprep.subr.bf16.mxu1 %v1562_v15 }
 0x3ad   : > { %v1112_v48 = vpop.permute.xlu1 %1111 }
 0x3ae   : > { %v1115_v40 = vsel %vm367_vm0, %v1113_v47, %v1114_v46  ;;  %v1546_v41 = vld [vmem:[#allocation5 + $0x38] ss:$12 sps:$4 sm:$0xff]   ;;  %v1117_v49 = vsel %vm490_vm8, %v1114_v46, %v1112_v48 }
 0x3af   : > { %v1116_v50 = vsel %vm490_vm8, %v1115_v40, %v1110_v45  ;;  %v1123_v52 = vpop.permute.xlu0 %1122  ;;  %1121 = vst [vmem:[#allocation5 + $0x5c] sm:$0xf] %v1117_v49  ;;  %1492 = vmatpush3.bf16.msra.mxu1 %v1546_v41 }
 0x3b0   : > { %v1128_v51 = vrot.slane %v1123_v52, 4  ;;  %v1432_v54 = vcombine.low %v1101_v44, %v1116_v50  ;;  %v1433_v55 = vcombine.high %v1101_v44, %v1116_v50  ;;  %1493 = vmatprep.subr.bf16.mxu1 %v1562_v15 }
 0x3b2   : > { %v1130_v3 = vsel %vm367_vm0, %v1128_v51, %v1129_v53  ;;  %1246 = vmatprep.subr.bf16.mxu0 %v1433_v55 }
 0x3b3   : > { %v1131_v56 = vsel %vm506_vm9, %v1130_v3, %v1125_v36  ;;  %v1127_v57 = vpop.permute.xlu0 %1126  ;;  %1247 = vmatpush1.bf16.msra.mxu0 %v1432_v54 }
 0x3b4   : > { %v1132_v58 = vsel %vm506_vm9, %v1129_v53, %v1127_v57  ;;  %v1436_v59 = vcombine.high %v1131_v56, %v1131_v56  ;;  %v1435_v60 = vcombine.low %v1131_v56, %v1131_v56 }
 0x3b5   : > { %1136 = vst [vmem:[#allocation5 + $0x68] sm:$0xf] %v1132_v58 }
 0x3b6   : > { %1438 = vmatprep.subr.msk.bf16.mxu0 %vm367_vm0, %v1436_v59  ;;  %v1232_v61 = vsel %vm367_vm0, %v1435_v60, 0  ;;  %v1547_v62 = vld [vmem:[#allocation5 + $0x50] ss:$12 sps:$4 sm:$0xff]  }
 0x3b7   : > { %1249 = vmatpush1.bf16.msra.mxu0 %v1232_v61  ;;  %1494 = vmatpush3.bf16.msra.mxu1 %v1547_v62 }
 0x3b8   : > { %1495 = vmatprep.subr.bf16.mxu1 %v1562_v15 }
 0x3ba   : > { %1439 = vmatmul.mubr.msk.bf16.vlgmr.msra.gmra.mrb[8].mxu0 %vm896_vm10, %v1137_v63 }
 0x3bc   : > { %v1548_v0 = vld [vmem:[#allocation5 + $0x68] ss:$0 sps:$4 sm:$0xff]  }
 0x3bd   : > { %v1238_v1 = vsel %vm367_vm0, %v1548_v0, 0 }
 0x3be   : > { %1496 = vmatpush3.bf16.msra.mxu1 %v1238_v1  ;;  %v341_v4 = vpop.permute.xlu1 %340 }
 0x3c1   : > { %1498 = vmatmul.mubr.msk.bf16.vlgmr.msra.gmra.mrb[8].mxu1 %vm896_vm10, %v1137_v63 }
 0x48d   : > { %v1274_v2 = vpop.f32.mrb[8].mxu0 }
 0x48e   : > { %v1276_v5 = vpop.f32.mrb[9].mxu0  ;;  %v1275_v6 = vadd.f32 %v1274_v2, %v341_v4 }
 0x48f   : > { %v1278_v7 = vpop.f32.mrb[10].mxu0  ;;  %v1277_v8 = vadd.f32 %v1276_v5, %v341_v4 }
 0x490   : > { %v1321_v15 = vmax.f32 %v1275_v6, 0.0  ;;  %v1279_v9 = vpop.f32.mrb[11].mxu0 }
 0x491   : > { %v1322_v10 = vmax.f32 %v1277_v8, 0.0 }
 0x492   : > { %1324 = vst [vmem:[%s305_s16] sm:$0xff] %v1321_v15 }
 0x493   : > { %1325 = vst [vmem:[%s305_s16 + $0x8] sm:$0xff] %v1322_v10 }
 0x494   : > { %v1315_v11 = vpop.f32.mrb[8].mxu1 }
 0x495   : > { %v1316_v12 = vadd.f32 %v1315_v11, %v341_v4  ;;  %v1499_v13 = vpop.f32.mrb[9].mxu1 }
 0x496   : > { %v1318_v14 = vpop.f32.mrb[10].mxu1 }
 0x497   : > { %v1323_v16 = vmax.f32 %v1316_v12, 0.0  ;;  %v1500_v17 = vpop.f32.mrb[11].mxu1 }
 0x499   : > { %1326 = vst [vmem:[%s305_s16 + $0x10] sm:$0xff] %v1323_v16 }
 0x49a PF: > { %s18_s27 = sadd.s32 1, %s1555_s27  }
 0x49b   : > { %p15_p4 = scmp.ge.s32.totalorder %s18_s27, 4  }
 0x49d   :  { %17 = sbr.rel (!%p15_p4) target bundleno = 1 (0x1), region = 82 }

</bundles_post_ra>
